<compile_context>
chip_gen: v5e
topology: v5e:2x2
jax: 0.10.0
libtpu: 0.0.40
codegen_flags: <defaults>
</compile_context>

<pallas_src>
import functools

import jax
import jax.numpy as jnp
from jax.experimental import pallas as pl
from jax.experimental.pallas import tpu as pltpu

_LANE = 128
_SUBLANE_BF16 = 16
_WENC_TILE_TARGET_BYTES = 8 * 1024 * 1024  # per-buffer streamed W_enc tile


def _round_up(n, m):
    return (n + m - 1) // m * m


def _device_kind():
    try:
        return jax.devices()[0].device_kind.lower()
    except Exception:
        return ""


def _num_tensorcores():
    k = _device_kind()
    # v7x has 2 TensorCores per chip; v5e/v6e have 1.
    return 2 if ("v7" in k or "7x" in k) else 1


def _vmem_limit_bytes():
    k = _device_kind()
    if "v5" in k or "v6" in k:
        return 96 * 1024 * 1024   # 128 MiB physical VMEM on v5e/v6e
    return 48 * 1024 * 1024       # 64 MiB physical VMEM on v7x (safe default)


def _pick_tp(P, td):
    """Size the streamed (tp, td) bf16 W_enc tile to ~8 MiB per buffer."""
    tp = max(512, (_WENC_TILE_TARGET_BYTES // (td * 2)) // 512 * 512)
    tp = min(tp, _round_up(P, 512))
    return tp


# --------------------------- fused kernel -----------------------------------


def _fused_encode_zeroshot_kernel(x_ref, wenc_ref, wzs_ref,
                                  plog_ref, psq_ref, acc_ref):
    """Encode (P-tiled reduction) + per-D-tile zero-shot epilogue.

    x_ref    : [Bp, tp]  bf16 flattened image tile
    wenc_ref : [tp, td]  bf16 encoder weight tile (streamed over p)
    wzs_ref  : [td, Kp]  f32  zero-shot class embeddings (resident per d tile)
    plog_ref : [Bp, Kp]  f32  partial (unnormalized) logits for this d tile
    psq_ref  : [Bp, 1]   f32  partial sum-of-squares for this d tile
    acc_ref  : [Bp, td]  f32  VMEM feature accumulator (persists across p)
    """
    p = pl.program_id(1)

    @pl.when(p == 0)
    def _():
        acc_ref[...] = jnp.zeros_like(acc_ref)

    acc_ref[...] += jnp.dot(x_ref[...], wenc_ref[...],
                            preferred_element_type=jnp.float32)

    @pl.when(p == pl.num_programs(1) - 1)
    def _():
        feat = acc_ref[...]                                    # [Bp, td] f32
        psq_ref[...] = jnp.sum(feat * feat, axis=-1, keepdims=True)
        # Keep f32 feat and f32 W_zs through the MXU: the zero-shot matmul is
        # tiny next to the encode matmul and this keeps full logit precision.
        plog_ref[...] = jnp.dot(feat, wzs_ref[...],
                                preferred_element_type=jnp.float32)


# --------------------------- wrapper -----------------------------------------


def prepare_zeroshot_params(w_enc, w_zs, *, n_d=None, tp=None):
    """One-time weight prep (cast + pad) kept OUT of the per-call hot path."""
    P, D = w_enc.shape
    D2, K = w_zs.shape
    assert D2 == D, (w_enc.shape, w_zs.shape)

    Dp = _round_up(D, _LANE)
    if n_d is None:
        n_d = _num_tensorcores() if Dp % (2 * _LANE) == 0 else 1
    assert Dp % n_d == 0 and (Dp // n_d) % _LANE == 0, (Dp, n_d)
    td = Dp // n_d

    if tp is None:
        tp = _pick_tp(P, td)
    Pp = _round_up(P, tp)
    Kp = _round_up(K, _LANE)

    w_enc_p = jnp.pad(w_enc.astype(jnp.bfloat16), ((0, Pp - P), (0, Dp - D)))
    w_zs_p = jnp.pad(w_zs.astype(jnp.float32), ((0, Dp - D), (0, Kp - K)))
    meta = dict(P=P, D=D, K=K, Pp=Pp, Dp=Dp, Kp=Kp, tp=tp, td=td, n_d=n_d)
    return w_enc_p, w_zs_p, meta


def _forward_impl(images, w_enc_p, w_zs_p, *, meta, vmem_limit):
    P, K = meta["P"], meta["K"]
    Pp, Kp = meta["Pp"], meta["Kp"]
    tp, td, n_d = meta["tp"], meta["td"], meta["n_d"]
    Dp = meta["Dp"]
    n_p = Pp // tp

    B = images.shape[0]
    x = images.reshape(B, -1).astype(jnp.bfloat16)
    assert x.shape[1] == P, (x.shape, P)
    Bp = _round_up(B, _SUBLANE_BF16)
    x = jnp.pad(x, ((0, Bp - B), (0, Pp - P)))

    cost = pl.CostEstimate(
        flops=2 * Bp * Pp * Dp + 2 * Bp * Dp * Kp + 2 * Bp * Dp,
        transcendentals=0,
        bytes_accessed=(2 * (n_d * Bp * Pp + Pp * Dp) + 4 * Dp * Kp
                        + 4 * n_d * Bp * (Kp + 1)),
    )

    plog, psq = pl.pallas_call(
        _fused_encode_zeroshot_kernel,
        out_shape=(
            jax.ShapeDtypeStruct((n_d, Bp, Kp), jnp.float32),
            jax.ShapeDtypeStruct((n_d, Bp, 1), jnp.float32),
        ),
        grid_spec=pltpu.PrefetchScalarGridSpec(
            num_scalar_prefetch=0,
            grid=(n_d, n_p),
            in_specs=[
                pl.BlockSpec((Bp, tp), lambda d, p: (0, p)),   # images
                pl.BlockSpec((tp, td), lambda d, p: (p, d)),   # W_enc streamed
                pl.BlockSpec((td, Kp), lambda d, p: (d, 0)),   # W_zs resident
            ],
            out_specs=[
                pl.BlockSpec((None, Bp, Kp), lambda d, p: (d, 0, 0)),
                pl.BlockSpec((None, Bp, 1), lambda d, p: (d, 0, 0)),
            ],
            scratch_shapes=[pltpu.VMEM((Bp, td), jnp.float32)],
        ),
        compiler_params=pltpu.CompilerParams(
            dimension_semantics=("parallel", "arbitrary"),
            vmem_limit_bytes=vmem_limit,
        ),
        cost_estimate=cost,
    )(x, w_enc_p, w_zs_p)

    # Tiny [B, K] XLA epilogue: combine D-tile partials and fuse
    # F.normalize(dim=-1, eps=1e-12) with the 100x logit scale:
    #   100 / max(||f||, 1e-12) == 100 * rsqrt(max(||f||^2, 1e-24)).
    logits = jnp.sum(plog, axis=0)[:B, :K]
    sq = jnp.sum(psq, axis=0)[:B, :]
    scale = 100.0 * jax.lax.rsqrt(jnp.maximum(sq, 1e-24))
    return logits * scale


def make_clip_in1k_zeroshot_forward(w_enc, w_zs, *, n_d=None, tp=None):
    """Builds forward(images) -> [B, K] logits with weights prepped once."""
    w_enc_p, w_zs_p, meta = prepare_zeroshot_params(w_enc, w_zs, n_d=n_d, tp=tp)
    fwd = jax.jit(functools.partial(_forward_impl, meta=meta,
                                    vmem_limit=_vmem_limit_bytes()))
    return lambda images: fwd(images, w_enc_p, w_zs_p)


# --------------------------- references --------------------------------------


def _reference_f32(images, w_enc, w_zs):
    """Exact module semantics in f32."""
    B = images.shape[0]
    x = images.reshape(B, -1).astype(jnp.float32)
    feat = x @ w_enc
    norm = jnp.sqrt(jnp.sum(feat * feat, axis=-1, keepdims=True))
    feat_n = feat / jnp.maximum(norm, 1e-12)
    return 100.0 * (feat_n @ w_zs)


def _reference_bf16_path(images, w_enc, w_zs):
    """Same math as the kernel: bf16 encode operands, f32 acc, f32 zero-shot."""
    B = images.shape[0]
    x = images.reshape(B, -1).astype(jnp.bfloat16)
    feat = jnp.dot(x, w_enc.astype(jnp.bfloat16),
                   preferred_element_type=jnp.float32)
    sq = jnp.sum(feat * feat, axis=-1, keepdims=True)
    logits = jnp.dot(feat, w_zs.astype(jnp.float32),
                     preferred_element_type=jnp.float32)
    return logits * (100.0 * jax.lax.rsqrt(jnp.maximum(sq, 1e-24)))


if __name__ == "__main__":
    # Small synthetic shapes consistent with the forward pass.
    B, C, H, W = 8, 4, 16, 16         # images NCHW
    P = C * H * W                     # flattened image dim = 1024
    D = 256                           # CLIP embedding dim (small synthetic)
    K = 256                           # number of classes (1000 in real IN1K)

    key = jax.random.PRNGKey(0)
    k_img, k_enc, k_zs = jax.random.split(key, 3)

    images = jax.random.normal(k_img, (B, C, H, W), dtype=jnp.float32)
    w_enc = jax.random.normal(k_enc, (P, D), dtype=jnp.float32) / jnp.sqrt(P)

    # Zero-shot class embeddings: unit-norm columns, as built in __init__.
    w_zs_raw = jax.random.normal(k_zs, (D, K), dtype=jnp.float32)
    w_zs = w_zs_raw / jnp.linalg.norm(w_zs_raw, axis=0, keepdims=True)

    ref_f32 = _reference_f32(images, w_enc, w_zs)
    ref_bf16 = _reference_bf16_path(images, w_enc, w_zs)

    # 1) Auto config (n_d = #TensorCores, tp sized from the VMEM budget).
    forward = make_clip_in1k_zeroshot_forward(w_enc, w_zs)
    logits = forward(images)
    jax.block_until_ready(logits)
    assert logits.shape == (B, K), logits.shape
    err_b = float(jnp.max(jnp.abs(logits - ref_bf16)))
    err_f = float(jnp.max(jnp.abs(logits - ref_f32)))
    assert err_b < 2e-2, f"mismatch vs bf16-path reference: {err_b}"
    assert err_f < 0.5, f"mismatch vs f32 reference: {err_f}"

    # 2) Force the split-D (v7x dual-TensorCore) path and a multi-step P
    #    reduction so both grid axes are exercised on any chip.
    forward_split = make_clip_in1k_zeroshot_forward(w_enc, w_zs, n_d=2, tp=512)
    logits2 = forward_split(images)
    jax.block_until_ready(logits2)
    err_b2 = float(jnp.max(jnp.abs(logits2 - ref_bf16)))
    err_f2 = float(jnp.max(jnp.abs(logits2 - ref_f32)))
    assert err_b2 < 2e-2, f"mismatch vs bf16-path reference (split): {err_b2}"
    assert err_f2 < 0.5, f"mismatch vs f32 reference (split): {err_f2}"

    print("KERNEL_OK")
</pallas_src>

<mosaic_0001>
module attributes {stable_mosaic.version = 11 : i64} {
  func.func @_fused_encode_zeroshot_kernel(%arg0: i32, %arg1: i32, %arg2: memref<16x1024xbf16, #tpu.memory_space<vmem>>, %arg3: memref<1024x256xbf16, #tpu.memory_space<vmem>>, %arg4: memref<256x256xf32, #tpu.memory_space<vmem>>, %arg5: memref<1x16x256xf32, #tpu.memory_space<vmem>>, %arg6: memref<1x16x1xf32, #tpu.memory_space<vmem>>, %arg7: memref<16x256xf32, #tpu.memory_space<vmem>>) attributes {dimension_semantics = [#tpu.dimension_semantics<parallel>, #tpu.dimension_semantics<arbitrary>], iteration_bounds = array<i64: 1, 1>, scalar_prefetch = 0 : i64, scratch_operands = 1 : i64, tpu.core_type = #tpu.core_type<tc>, window_params = [{transform_indices = @transform_0, window_bounds = array<i64: 16, 1024>}, {transform_indices = @transform_1, window_bounds = array<i64: 1024, 256>}, {transform_indices = @transform_2, window_bounds = array<i64: 256, 256>}, {transform_indices = @transform_3, window_bounds = array<i64: 1, 16, 256>}, {transform_indices = @transform_4, window_bounds = array<i64: 1, 16, 1>}]} {
    %c0_i32 = arith.constant 0 : i32
    %0 = arith.cmpi eq, %arg1, %c0_i32 : i32
    %1 = arith.extui %0 : i1 to i32
    %c0_i32_0 = arith.constant 0 : i32
    %2 = arith.cmpi ne, %1, %c0_i32_0 : i32
    scf.if %2 {
      %cst_10 = arith.constant 0.000000e+00 : f32
      %12 = vector.broadcast %cst_10 : f32 to vector<16x256xf32>
      %c0_11 = arith.constant 0 : index
      %c0_12 = arith.constant 0 : index
      %13 = vector.load %arg7[%c0_11, %c0_12] : memref<16x256xf32, #tpu.memory_space<vmem>>, vector<16x256xf32>
      tpu.vector_store %arg7[%c0_11, %c0_12], %12 {strides = array<i32>} : memref<16x256xf32, #tpu.memory_space<vmem>>, vector<16x256xf32>,
    } else {
    }
    %c0 = arith.constant 0 : index
    %c0_1 = arith.constant 0 : index
    %3 = vector.load %arg7[%c0, %c0_1] : memref<16x256xf32, #tpu.memory_space<vmem>>, vector<16x256xf32>
    %c0_2 = arith.constant 0 : index
    %c0_3 = arith.constant 0 : index
    %4 = vector.load %arg2[%c0_2, %c0_3] : memref<16x1024xbf16, #tpu.memory_space<vmem>>, vector<16x1024xbf16>
    %c0_4 = arith.constant 0 : index
    %c0_5 = arith.constant 0 : index
    %5 = vector.load %arg3[%c0_4, %c0_5] : memref<1024x256xbf16, #tpu.memory_space<vmem>>, vector<1024x256xbf16>
    %cst = arith.constant dense<0.000000e+00> : vector<16x256xf32>
    %6 = tpu.matmul %4, %5, %cst {dimension_numbers = #tpu.dot_dimension_numbers<[1], [0], [0], [1], [0, 0, 1, 1], [], []>} : vector<16x1024xbf16>, vector<1024x256xbf16>, vector<16x256xf32> -> vector<16x256xf32>
    %7 = arith.addf %3, %6 : vector<16x256xf32>
    %c0_6 = arith.constant 0 : index
    %c0_7 = arith.constant 0 : index
    %8 = vector.load %arg7[%c0_6, %c0_7] : memref<16x256xf32, #tpu.memory_space<vmem>>, vector<16x256xf32>
    tpu.vector_store %arg7[%c0_6, %c0_7], %7 {strides = array<i32>} : memref<16x256xf32, #tpu.memory_space<vmem>>, vector<16x256xf32>,
    %c0_i32_8 = arith.constant 0 : i32
    %9 = arith.cmpi eq, %arg1, %c0_i32_8 : i32
    %10 = arith.extui %9 : i1 to i32
    %c0_i32_9 = arith.constant 0 : i32
    %11 = arith.cmpi ne, %10, %c0_i32_9 : i32
    scf.if %11 {
      %c0_10 = arith.constant 0 : index
      %c0_11 = arith.constant 0 : index
      %12 = vector.load %arg7[%c0_10, %c0_11] : memref<16x256xf32, #tpu.memory_space<vmem>>, vector<16x256xf32>
      %13 = arith.mulf %12, %12 : vector<16x256xf32>
      %cst_12 = arith.constant dense<0.000000e+00> : vector<16xf32>
      %14 = vector.multi_reduction <add>, %13, %cst_12 [1] : vector<16x256xf32> to vector<16xf32>
      %15 = vector.shape_cast %14 : vector<16xf32> to vector<16x1xf32>
      %c0_13 = arith.constant 0 : index
      %c0_14 = arith.constant 0 : index
      %c0_15 = arith.constant 0 : index
      %16 = vector.load %arg6[%c0_13, %c0_14, %c0_15] : memref<1x16x1xf32, #tpu.memory_space<vmem>>, vector<1x16x1xf32>
      %17 = vector.shape_cast %16 : vector<1x16x1xf32> to vector<16x1xf32>
      %18 = vector.shape_cast %15 : vector<16x1xf32> to vector<1x16x1xf32>
      tpu.vector_store %arg6[%c0_13, %c0_14, %c0_15], %18 {strides = array<i32>} : memref<1x16x1xf32, #tpu.memory_space<vmem>>, vector<1x16x1xf32>,
      %c0_16 = arith.constant 0 : index
      %c0_17 = arith.constant 0 : index
      %19 = vector.load %arg4[%c0_16, %c0_17] : memref<256x256xf32, #tpu.memory_space<vmem>>, vector<256x256xf32>
      %cst_18 = arith.constant dense<0.000000e+00> : vector<16x256xf32>
      %20 = tpu.matmul %12, %19, %cst_18 {dimension_numbers = #tpu.dot_dimension_numbers<[1], [0], [0], [1], [0, 0, 1, 1], [], []>} : vector<16x256xf32>, vector<256x256xf32>, vector<16x256xf32> -> vector<16x256xf32>
      %c0_19 = arith.constant 0 : index
      %c0_20 = arith.constant 0 : index
      %c0_21 = arith.constant 0 : index
      %21 = vector.load %arg5[%c0_19, %c0_20, %c0_21] : memref<1x16x256xf32, #tpu.memory_space<vmem>>, vector<1x16x256xf32>
      %22 = vector.shape_cast %21 : vector<1x16x256xf32> to vector<16x256xf32>
      %23 = vector.shape_cast %20 : vector<16x256xf32> to vector<1x16x256xf32>
      tpu.vector_store %arg5[%c0_19, %c0_20, %c0_21], %23 {strides = array<i32>} : memref<1x16x256xf32, #tpu.memory_space<vmem>>, vector<1x16x256xf32>,
    } else {
    }
    return
  }
  func.func @transform_0(%arg0: i32, %arg1: i32) -> (i32, i32) {
    %c0_i32 = arith.constant 0 : i32
    %c0_i32_0 = arith.constant 0 : i32
    return %c0_i32, %arg1 : i32, i32
  }
  func.func @transform_1(%arg0: i32, %arg1: i32) -> (i32, i32) {
    %c0_i32 = arith.constant 0 : i32
    return %arg1, %arg0 : i32, i32
  }
  func.func @transform_2(%arg0: i32, %arg1: i32) -> (i32, i32) {
    %c0_i32 = arith.constant 0 : i32
    %c0_i32_0 = arith.constant 0 : i32
    return %arg0, %c0_i32 : i32, i32
  }
  func.func @transform_3(%arg0: i32, %arg1: i32) -> (i32, i32, i32) {
    %c0_i32 = arith.constant 0 : i32
    %c0_i32_0 = arith.constant 0 : i32
    %c0_i32_1 = arith.constant 0 : i32
    return %arg0, %c0_i32, %c0_i32_0 : i32, i32, i32
  }
  func.func @transform_4(%arg0: i32, %arg1: i32) -> (i32, i32, i32) {
    %c0_i32 = arith.constant 0 : i32
    %c0_i32_0 = arith.constant 0 : i32
    %c0_i32_1 = arith.constant 0 : i32
    return %arg0, %c0_i32, %c0_i32_0 : i32, i32, i32
  }
}

</mosaic_0001>

<bundles_post_ra>
// kernel: _forward_impl.1
= control target key start
LH: loop header
LB: loop body
LE: loop exit
PB: predicated region body
PF: predicated region fallthrough
CT: control target
= control target key end

     0   :  { %10 = vsyncpa [#allocation4], 0  ;;  %s1990_s18 = smov [#allocation3]   ;;  %s1991_s20 = smov 256   ;;  %s2899_s0 = inlined_call_operand.vmem [shape: bf16[16,1024], index: 0, kind: input, shape index: {}]   ;;  %s2900_s1 = inlined_call_operand.vmem [shape: bf16[1024,256], index: 1, kind: input, shape index: {}]   ;;  %s2901_s2 = inlined_call_operand.hbm [shape: f32[256,256], index: 2, kind: input, shape index: {}]   ;;  %s2902_s3 = inlined_call_operand.vmem [shape: f32[1,16,256], index: 3, kind: output, shape index: {0}]   ;;  %s2903_s4 = inlined_call_operand.vmem [shape: f32[1,16,1], index: 4, kind: output, shape index: {1}]  }
   0x1   :  { %s19_s17 = sshll.u32 %s2901_s2, 4  ;;  %s21_s19 = sshll.u32 %s1990_s18, 4  ;;  %s20_s17 = int_to_ptr.hbm [resolvable:$true] %s19_s17  ;;  %s22_s19 = int_to_ptr.vmem [resolvable:$true] %s21_s19 }
   0x2   :  { %s1992_s21 = smov 16  }
   0x3   :  { %27 = dma.hbm_to_vmem [thread:$0]  %s20_s17, 8192, %s22_s19, [#allocation4], %s1991_s20, %s1991_s20, %s1992_s21  }
   0x4   :  { %1988 = dma.done.wait [#allocation4], 8192  }
   0x5   :  { %1989 = vsyncadd [#allocation4], 4294959104  ;;  %v1371_v0 = vld [vmem:[%s2900_s1 + $0x70] sm:$0xf]  ;;  %v1848_v1 = vld [vmem:[%s2900_s1 + $0x74] sm:$0xf0] }
   0x6   :  { %v1435_v2 = vld [vmem:[%s2900_s1 + $0xf0] sm:$0xf]  ;;  %v1372_v3 = vor.u32 %v1848_v1, %v1371_v0  ;;  %v1864_v4 = vld [vmem:[%s2900_s1 + $0xf4] sm:$0xf0]  ;;  %v1363_v11 = vld [vmem:[%s2900_s1 + $0x60] sm:$0xf] }
   0x7   :  { %v1499_v5 = vld [vmem:[%s2900_s1 + $0x170] sm:$0xf]  ;;  %v1880_v6 = vld [vmem:[%s2900_s1 + $0x174] sm:$0xf0]  ;;  %v1436_v7 = vor.u32 %v1864_v4, %v1435_v2  ;;  %v1846_v13 = vld [vmem:[%s2900_s1 + $0x64] sm:$0xf0] }
   0x8   :  { %v1500_v8 = vor.u32 %v1880_v6, %v1499_v5  ;;  %v1563_v9 = vld [vmem:[%s2900_s1 + $0x1f0] sm:$0xf]  ;;  %v1896_v10 = vld [vmem:[%s2900_s1 + $0x1f4] sm:$0xf0]  ;;  %860 = vmatpush.bf16.msra.mxu0 %v1372_v3  ;;  %v1427_v14 = vld [vmem:[%s2900_s1 + $0xe0] sm:$0xf]  ;;  %v1364_v16 = vor.u32 %v1846_v13, %v1363_v11 }
   0x9   :  { %v1564_v12 = vor.u32 %v1896_v10, %v1563_v9  ;;  %v1862_v15 = vld [vmem:[%s2900_s1 + $0xe4] sm:$0xf0]  ;;  %874 = vmatpush.bf16.msra.mxu1 %v1436_v7  ;;  %v1491_v18 = vld [vmem:[%s2900_s1 + $0x160] sm:$0xf]  ;;  %v1355_v23 = vld [vmem:[%s2900_s1 + $0x50] sm:$0xf] }
   0xa   :  { %888 = vmatpush.bf16.msra.mxu2 %v1500_v8  ;;  %v1428_v17 = vor.u32 %v1862_v15, %v1427_v14  ;;  %v1878_v19 = vld [vmem:[%s2900_s1 + $0x164] sm:$0xf0]  ;;  %v1555_v20 = vld [vmem:[%s2900_s1 + $0x1e0] sm:$0xf]  ;;  %v1844_v24 = vld [vmem:[%s2900_s1 + $0x54] sm:$0xf0] }
   0xb   :  { %902 = vmatpush.bf16.msra.mxu3 %v1564_v12  ;;  %v1492_v21 = vor.u32 %v1878_v19, %v1491_v18  ;;  %v1894_v22 = vld [vmem:[%s2900_s1 + $0x1e4] sm:$0xf0]  ;;  %v1419_v26 = vld [vmem:[%s2900_s1 + $0xd0] sm:$0xf]  ;;  %v1860_v27 = vld [vmem:[%s2900_s1 + $0xd4] sm:$0xf0]  ;;  %v1356_v29 = vor.u32 %v1844_v24, %v1355_v23 }
   0xc   :  { %v1556_v25 = vor.u32 %v1894_v22, %v1555_v20  ;;  %v1483_v28 = vld [vmem:[%s2900_s1 + $0x150] sm:$0xf]  ;;  %861 = vmatpush.bf16.msra.mxu0 %v1364_v16  ;;  %v1876_v30 = vld [vmem:[%s2900_s1 + $0x154] sm:$0xf0]  ;;  %v1420_v33 = vor.u32 %v1860_v27, %v1419_v26  ;;  %v1347_v35 = vld [vmem:[%s2900_s1 + $0x40] sm:$0xf] }
   0xd   :  { %v1547_v31 = vld [vmem:[%s2900_s1 + $0x1d0] sm:$0xf]  ;;  %v1892_v32 = vld [vmem:[%s2900_s1 + $0x1d4] sm:$0xf0]  ;;  %875 = vmatpush.bf16.msra.mxu1 %v1428_v17  ;;  %v1484_v34 = vor.u32 %v1876_v30, %v1483_v28  ;;  %v1842_v36 = vld [vmem:[%s2900_s1 + $0x44] sm:$0xf0] }
   0xe   :  { %889 = vmatpush.bf16.msra.mxu2 %v1492_v21  ;;  %v1411_v37 = vld [vmem:[%s2900_s1 + $0xc0] sm:$0xf]  ;;  %v1548_v38 = vor.u32 %v1892_v32, %v1547_v31  ;;  %v1858_v39 = vld [vmem:[%s2900_s1 + $0xc4] sm:$0xf0]  ;;  %v1348_v44 = vor.u32 %v1842_v36, %v1347_v35  ;;  %v1339_v47 = vld [vmem:[%s2900_s1 + $0x30] sm:$0xf] }
   0xf   :  { %903 = vmatpush.bf16.msra.mxu3 %v1556_v25  ;;  %v1475_v40 = vld [vmem:[%s2900_s1 + $0x140] sm:$0xf]  ;;  %v1874_v41 = vld [vmem:[%s2900_s1 + $0x144] sm:$0xf0]  ;;  %v1412_v45 = vor.u32 %v1858_v39, %v1411_v37  ;;  %v1840_v48 = vld [vmem:[%s2900_s1 + $0x34] sm:$0xf0] }
  0x10   :  { %v1539_v42 = vld [vmem:[%s2900_s1 + $0x1c0] sm:$0xf]  ;;  %v1890_v43 = vld [vmem:[%s2900_s1 + $0x1c4] sm:$0xf0]  ;;  %862 = vmatpush.bf16.msra.mxu0 %v1356_v29  ;;  %v1476_v46 = vor.u32 %v1874_v41, %v1475_v40  ;;  %v1403_v49 = vld [vmem:[%s2900_s1 + $0xb0] sm:$0xf]  ;;  %v1340_v56 = vor.u32 %v1840_v48, %v1339_v47 }
  0x11   :  { %876 = vmatpush.bf16.msra.mxu1 %v1420_v33  ;;  %v1540_v50 = vor.u32 %v1890_v43, %v1539_v42  ;;  %v1856_v51 = vld [vmem:[%s2900_s1 + $0xb4] sm:$0xf0]  ;;  %v1467_v52 = vld [vmem:[%s2900_s1 + $0x130] sm:$0xf]  ;;  %v1331_v59 = vld [vmem:[%s2900_s1 + $0x20] sm:$0xf] }
  0x12   :  { %890 = vmatpush.bf16.msra.mxu2 %v1484_v34  ;;  %v1872_v53 = vld [vmem:[%s2900_s1 + $0x134] sm:$0xf0]  ;;  %v1531_v54 = vld [vmem:[%s2900_s1 + $0x1b0] sm:$0xf]  ;;  %v1404_v57 = vor.u32 %v1856_v51, %v1403_v49  ;;  %v1838_v60 = vld [vmem:[%s2900_s1 + $0x24] sm:$0xf0] }
  0x13   :  { %904 = vmatpush.bf16.msra.mxu3 %v1548_v38  ;;  %v1888_v55 = vld [vmem:[%s2900_s1 + $0x1b4] sm:$0xf0]  ;;  %v1468_v58 = vor.u32 %v1872_v53, %v1467_v52  ;;  %v1395_v61 = vld [vmem:[%s2900_s1 + $0xa0] sm:$0xf]  ;;  %v1854_v63 = vld [vmem:[%s2900_s1 + $0xa4] sm:$0xf0]  ;;  %v1332_v4 = vor.u32 %v1838_v60, %v1331_v59 }
  0x14   :  { %863 = vmatpush.bf16.msra.mxu0 %v1348_v44  ;;  %v1532_v62 = vor.u32 %v1888_v55, %v1531_v54  ;;  %v1459_v0 = vld [vmem:[%s2900_s1 + $0x120] sm:$0xf]  ;;  %v1870_v1 = vld [vmem:[%s2900_s1 + $0x124] sm:$0xf0]  ;;  %v1396_v5 = vor.u32 %v1854_v63, %v1395_v61  ;;  %v1323_v7 = vld [vmem:[%s2900_s1 + $0x10] sm:$0xf] }
  0x15   :  { %877 = vmatpush.bf16.msra.mxu1 %v1412_v45  ;;  %v1523_v2 = vld [vmem:[%s2900_s1 + $0x1a0] sm:$0xf]  ;;  %v1886_v3 = vld [vmem:[%s2900_s1 + $0x1a4] sm:$0xf0]  ;;  %v1460_v6 = vor.u32 %v1870_v1, %v1459_v0  ;;  %v1836_v8 = vld [vmem:[%s2900_s1 + $0x14] sm:$0xf0] }
  0x16   :  { %891 = vmatpush.bf16.msra.mxu2 %v1476_v46  ;;  %v1387_v9 = vld [vmem:[%s2900_s1 + $0x90] sm:$0xf]  ;;  %v1524_v10 = vor.u32 %v1886_v3, %v1523_v2  ;;  %v1852_v11 = vld [vmem:[%s2900_s1 + $0x94] sm:$0xf0]  ;;  %v1324_v16 = vor.u32 %v1836_v8, %v1323_v7  ;;  %v1315_v17 = vld [vmem:[%s2900_s1] sm:$0xf] }
  0x17   :  { %905 = vmatpush.bf16.msra.mxu3 %v1540_v50  ;;  %v1451_v12 = vld [vmem:[%s2900_s1 + $0x110] sm:$0xf]  ;;  %v1868_v13 = vld [vmem:[%s2900_s1 + $0x114] sm:$0xf0]  ;;  %v1834_v18 = vld [vmem:[%s2900_s1 + $0x4] sm:$0xf0]  ;;  %v1388_v19 = vor.u32 %v1852_v11, %v1387_v9 }
  0x18   :  { %864 = vmatpush.bf16.msra.mxu0 %v1340_v56  ;;  %v1515_v14 = vld [vmem:[%s2900_s1 + $0x190] sm:$0xf]  ;;  %v1884_v15 = vld [vmem:[%s2900_s1 + $0x194] sm:$0xf0]  ;;  %v1452_v20 = vor.u32 %v1868_v13, %v1451_v12  ;;  %v1379_v21 = vld [vmem:[%s2900_s1 + $0x80] sm:$0xf]  ;;  %v1316_v31 = vor.u32 %v1834_v18, %v1315_v17 }
  0x19   :  { %878 = vmatpush.bf16.msra.mxu1 %v1404_v57  ;;  %v1850_v22 = vld [vmem:[%s2900_s1 + $0x84] sm:$0xf0]  ;;  %v1443_v23 = vld [vmem:[%s2900_s1 + $0x100] sm:$0xf]  ;;  %v1516_v24 = vor.u32 %v1884_v15, %v1515_v14  ;;  %v1627_v28 = vld [vmem:[%s2900_s1 + $0x270] sm:$0xf] }
  0x1a   :  { %892 = vmatpush.bf16.msra.mxu2 %v1468_v58  ;;  %v1866_v25 = vld [vmem:[%s2900_s1 + $0x104] sm:$0xf0]  ;;  %v1507_v26 = vld [vmem:[%s2900_s1 + $0x180] sm:$0xf]  ;;  %v1912_v29 = vld [vmem:[%s2900_s1 + $0x274] sm:$0xf0]  ;;  %v1380_v35 = vor.u32 %v1850_v22, %v1379_v21 }
  0x1b   :  { %906 = vmatpush.bf16.msra.mxu3 %v1532_v62  ;;  %v1882_v27 = vld [vmem:[%s2900_s1 + $0x184] sm:$0xf0]  ;;  %v1691_v30 = vld [vmem:[%s2900_s1 + $0x2f0] sm:$0xf]  ;;  %v1928_v32 = vld [vmem:[%s2900_s1 + $0x2f4] sm:$0xf0]  ;;  %v1444_v36 = vor.u32 %v1866_v25, %v1443_v23  ;;  %v1628_v40 = vor.u32 %v1912_v29, %v1627_v28 }
  0x1c   :  { %865 = vmatpush.bf16.msra.mxu0 %v1332_v4  ;;  %v1755_v33 = vld [vmem:[%s2900_s1 + $0x370] sm:$0xf]  ;;  %v1944_v34 = vld [vmem:[%s2900_s1 + $0x374] sm:$0xf0]  ;;  %v1508_v39 = vor.u32 %v1882_v27, %v1507_v26  ;;  %v1619_v41 = vld [vmem:[%s2900_s1 + $0x260] sm:$0xf]  ;;  %v1692_v43 = vor.u32 %v1928_v32, %v1691_v30 }
  0x1d   :  { %879 = vmatpush.bf16.msra.mxu1 %v1396_v5  ;;  %v1819_v37 = vld [vmem:[%s2900_s1 + $0x3f0] sm:$0xf]  ;;  %v1960_v38 = vld [vmem:[%s2900_s1 + $0x3f4] sm:$0xf0]  ;;  %v1910_v42 = vld [vmem:[%s2900_s1 + $0x264] sm:$0xf0]  ;;  %v1756_v44 = vor.u32 %v1944_v34, %v1755_v33 }
  0x1e   :  { %893 = vmatpush.bf16.msra.mxu2 %v1460_v6  ;;  %v1683_v45 = vld [vmem:[%s2900_s1 + $0x2e0] sm:$0xf]  ;;  %v1926_v46 = vld [vmem:[%s2900_s1 + $0x2e4] sm:$0xf0]  ;;  %v1820_v48 = vor.u32 %v1960_v38, %v1819_v37  ;;  %v1620_v55 = vor.u32 %v1910_v42, %v1619_v41  ;;  %v1611_v56 = vld [vmem:[%s2900_s1 + $0x250] sm:$0xf] }
  0x1f   :  { %907 = vmatpush.bf16.msra.mxu3 %v1524_v10  ;;  %v1747_v47 = vld [vmem:[%s2900_s1 + $0x360] sm:$0xf]  ;;  %v1942_v49 = vld [vmem:[%s2900_s1 + $0x364] sm:$0xf0]  ;;  %v1908_v57 = vld [vmem:[%s2900_s1 + $0x254] sm:$0xf0]  ;;  %v1684_v60 = vor.u32 %v1926_v46, %v1683_v45 }
  0x20   :  { %866 = vmatpush.bf16.msra.mxu0 %v1324_v16  ;;  %v1811_v50 = vld [vmem:[%s2900_s1 + $0x3e0] sm:$0xf]  ;;  %v1958_v51 = vld [vmem:[%s2900_s1 + $0x3e4] sm:$0xf0]  ;;  %v1748_v61 = vor.u32 %v1942_v49, %v1747_v47  ;;  %v1675_v62 = vld [vmem:[%s2900_s1 + $0x2d0] sm:$0xf]  ;;  %v1612_v9 = vor.u32 %v1908_v57, %v1611_v56 }
  0x21   :  { %880 = vmatpush.bf16.msra.mxu1 %v1388_v19  ;;  %v1283_v52 = vld [vmem:[%s2899_s0] sm:$0xf]  ;;  %v1291_v54 = vld [vmem:[%s2899_s0 + $0x8] sm:$0xf]  ;;  %v1924_v63 = vld [vmem:[%s2900_s1 + $0x2d4] sm:$0xf0]  ;;  %v1812_v2 = vor.u32 %v1958_v51, %v1811_v50 }
  0x22   :  { %894 = vmatpush.bf16.msra.mxu2 %v1452_v20  ;;  %v1829_v53 = vld [vmem:[%s2899_s0 + $0x1c] sm:$0xf0]  ;;  %v1830_v59 = vld [vmem:[%s2899_s0 + $0x24] sm:$0xf0]  ;;  %v1739_v0 = vld [vmem:[%s2900_s1 + $0x350] sm:$0xf]  ;;  %v1676_v12 = vor.u32 %v1924_v63, %v1675_v62 }
  0x23   :  { %908 = vmatpush.bf16.msra.mxu3 %v1516_v24  ;;  %v2276_v58 = vor.u32 %v1829_v53, %v1283_v52  ;;  %v2290_v1 = vor.u32 %v1830_v59, %v1291_v54  ;;  %v1940_v3 = vld [vmem:[%s2900_s1 + $0x354] sm:$0xf0]  ;;  %v1803_v4 = vld [vmem:[%s2900_s1 + $0x3d0] sm:$0xf]  ;;  %v1825_v6 = vld [vmem:[%s2899_s0 + $0x4] sm:$0xf] }
  0x24   :  { %867 = vmatpush.bf16.msra.mxu0 %v1316_v31  ;;  %v1956_v5 = vld [vmem:[%s2900_s1 + $0x3d4] sm:$0xf0]  ;;  %v1285_v7 = vld [vmem:[%s2899_s0 + $0x20] sm:$0xf0]  ;;  %v1826_v8 = vld [vmem:[%s2899_s0 + $0xc] sm:$0xf]  ;;  %v1740_v13 = vor.u32 %v1940_v3, %v1739_v0 }
  0x25   :  { %881 = vmatpush.bf16.msra.mxu1 %v1380_v35  ;;  %v2312_v10 = vor.u32 %v1825_v6, %v1285_v7  ;;  %v1293_v11 = vld [vmem:[%s2899_s0 + $0x28] sm:$0xf0]  ;;  %v1603_v14 = vld [vmem:[%s2900_s1 + $0x240] sm:$0xf]  ;;  %v1906_v15 = vld [vmem:[%s2900_s1 + $0x244] sm:$0xf0]  ;;  %v1804_v18 = vor.u32 %v1956_v5, %v1803_v4 }
  0x26   :  { %895 = vmatpush.bf16.msra.mxu2 %v1444_v36  ;;  %v1667_v16 = vld [vmem:[%s2900_s1 + $0x2c0] sm:$0xf]  ;;  %v2326_v17 = vor.u32 %v1826_v8, %v1293_v11  ;;  %v1922_v19 = vld [vmem:[%s2900_s1 + $0x2c4] sm:$0xf0]  ;;  %v1604_v24 = vor.u32 %v1906_v15, %v1603_v14  ;;  %v1595_v27 = vld [vmem:[%s2900_s1 + $0x230] sm:$0xf] }
  0x27   :  { %909 = vmatpush.bf16.msra.mxu3 %v1508_v39  ;;  %868 = vmatmul.bf16.vlgmr.msra.gmra.mxu0 %v2276_v58  ;;  %v1731_v20 = vld [vmem:[%s2900_s1 + $0x340] sm:$0xf]  ;;  %v1938_v21 = vld [vmem:[%s2900_s1 + $0x344] sm:$0xf0]  ;;  %v1668_v25 = vor.u32 %v1922_v19, %v1667_v16  ;;  %v1904_v28 = vld [vmem:[%s2900_s1 + $0x234] sm:$0xf0] }
  0x28   :  { %916 = vmatpush.bf16.msrb.mxu0 %v1628_v40  ;;  %882 = vmatmul.bf16.vlgmr.msra.gmra.mxu1 %v2312_v10  ;;  %v1795_v22 = vld [vmem:[%s2900_s1 + $0x3c0] sm:$0xf]  ;;  %v1954_v23 = vld [vmem:[%s2900_s1 + $0x3c4] sm:$0xf0]  ;;  %v1732_v26 = vor.u32 %v1938_v21, %v1731_v20  ;;  %v1659_v29 = vld [vmem:[%s2900_s1 + $0x2b0] sm:$0xf]  ;;  %v1596_v36 = vor.u32 %v1904_v28, %v1595_v27 }
  0x29   :  { %930 = vmatpush.bf16.msrb.mxu1 %v1692_v43  ;;  %896 = vmatmul.bf16.vlgmr.msra.gmra.mxu2 %v2290_v1  ;;  %v1796_v30 = vor.u32 %v1954_v23, %v1795_v22  ;;  %v1920_v31 = vld [vmem:[%s2900_s1 + $0x2b4] sm:$0xf0]  ;;  %v1723_v32 = vld [vmem:[%s2900_s1 + $0x330] sm:$0xf]  ;;  %v1587_v39 = vld [vmem:[%s2900_s1 + $0x220] sm:$0xf] }
  0x2a   :  { %944 = vmatpush.bf16.msrb.mxu2 %v1756_v44  ;;  %910 = vmatmul.bf16.vlgmr.msra.gmra.mxu3 %v2326_v17  ;;  %v1936_v33 = vld [vmem:[%s2900_s1 + $0x334] sm:$0xf0]  ;;  %v1787_v34 = vld [vmem:[%s2900_s1 + $0x3b0] sm:$0xf]  ;;  %v1660_v37 = vor.u32 %v1920_v31, %v1659_v29  ;;  %v1902_v40 = vld [vmem:[%s2900_s1 + $0x224] sm:$0xf0] }
  0x2b   :  { %958 = vmatpush.bf16.msrb.mxu3 %v1820_v48  ;;  %v1952_v35 = vld [vmem:[%s2900_s1 + $0x3b4] sm:$0xf0]  ;;  %v1724_v38 = vor.u32 %v1936_v33, %v1723_v32  ;;  %v1651_v41 = vld [vmem:[%s2900_s1 + $0x2a0] sm:$0xf]  ;;  %v1918_v43 = vld [vmem:[%s2900_s1 + $0x2a4] sm:$0xf0]  ;;  %v1588_v48 = vor.u32 %v1902_v40, %v1587_v39 }
  0x2c   :  { %917 = vmatpush.bf16.msrb.mxu0 %v1620_v55  ;;  %v1788_v42 = vor.u32 %v1952_v35, %v1787_v34  ;;  %v1715_v44 = vld [vmem:[%s2900_s1 + $0x320] sm:$0xf]  ;;  %v1934_v45 = vld [vmem:[%s2900_s1 + $0x324] sm:$0xf0]  ;;  %v1579_v49 = vld [vmem:[%s2900_s1 + $0x210] sm:$0xf]  ;;  %v1652_v50 = vor.u32 %v1918_v43, %v1651_v41 }
  0x2d   :  { %931 = vmatpush.bf16.msrb.mxu1 %v1684_v60  ;;  %v1779_v46 = vld [vmem:[%s2900_s1 + $0x3a0] sm:$0xf]  ;;  %v1950_v47 = vld [vmem:[%s2900_s1 + $0x3a4] sm:$0xf0]  ;;  %v1716_v51 = vor.u32 %v1934_v45, %v1715_v44  ;;  %v1900_v52 = vld [vmem:[%s2900_s1 + $0x214] sm:$0xf0] }
  0x2e   :  { %945 = vmatpush.bf16.msrb.mxu2 %v1748_v61  ;;  %v1643_v53 = vld [vmem:[%s2900_s1 + $0x290] sm:$0xf]  ;;  %v1916_v54 = vld [vmem:[%s2900_s1 + $0x294] sm:$0xf0]  ;;  %v1780_v55 = vor.u32 %v1950_v47, %v1779_v46  ;;  %v1571_v61 = vld [vmem:[%s2900_s1 + $0x200] sm:$0xf]  ;;  %v1580_v63 = vor.u32 %v1900_v52, %v1579_v49 }
  0x2f   :  { %959 = vmatpush.bf16.msrb.mxu3 %v1812_v2  ;;  %v1707_v56 = vld [vmem:[%s2900_s1 + $0x310] sm:$0xf]  ;;  %v1932_v57 = vld [vmem:[%s2900_s1 + $0x314] sm:$0xf0]  ;;  %v1898_v62 = vld [vmem:[%s2900_s1 + $0x204] sm:$0xf0]  ;;  %v1644_v5 = vor.u32 %v1916_v54, %v1643_v53 }
  0x30   :  { %918 = vmatpush.bf16.msrb.mxu0 %v1612_v9  ;;  %v1771_v59 = vld [vmem:[%s2900_s1 + $0x390] sm:$0xf]  ;;  %v1948_v60 = vld [vmem:[%s2900_s1 + $0x394] sm:$0xf0]  ;;  %v1635_v0 = vld [vmem:[%s2900_s1 + $0x280] sm:$0xf]  ;;  %v1708_v6 = vor.u32 %v1932_v57, %v1707_v56  ;;  %v1572_v19 = vor.u32 %v1898_v62, %v1571_v61 }
  0x31   :  { %932 = vmatpush.bf16.msrb.mxu1 %v1676_v12  ;;  %v1914_v2 = vld [vmem:[%s2900_s1 + $0x284] sm:$0xf0]  ;;  %v1699_v3 = vld [vmem:[%s2900_s1 + $0x300] sm:$0xf]  ;;  %v1847_v9 = vld [vmem:[%s2900_s1 + $0x74] sm:$0xf]  ;;  %v1772_v11 = vor.u32 %v1948_v60, %v1771_v59 }
  0x32   :  { %946 = vmatpush.bf16.msrb.mxu2 %v1740_v13  ;;  %v1930_v4 = vld [vmem:[%s2900_s1 + $0x304] sm:$0xf0]  ;;  %v1763_v7 = vld [vmem:[%s2900_s1 + $0x380] sm:$0xf]  ;;  %v1373_v12 = vld [vmem:[%s2900_s1 + $0x78] sm:$0xf0]  ;;  %v1636_v23 = vor.u32 %v1914_v2, %v1635_v0 }
  0x33   :  { %960 = vmatpush.bf16.msrb.mxu3 %v1804_v18  ;;  %v1946_v8 = vld [vmem:[%s2900_s1 + $0x384] sm:$0xf0]  ;;  %v1863_v13 = vld [vmem:[%s2900_s1 + $0xf4] sm:$0xf]  ;;  %v1437_v14 = vld [vmem:[%s2900_s1 + $0xf8] sm:$0xf0]  ;;  %v1376_v29 = vor.u32 %v1847_v9, %v1373_v12 }
  0x34   :  { %919 = vmatpush.bf16.msrb.mxu0 %v1604_v24  ;;  %v1879_v15 = vld [vmem:[%s2900_s1 + $0x174] sm:$0xf]  ;;  %v1501_v16 = vld [vmem:[%s2900_s1 + $0x178] sm:$0xf0]  ;;  %v1299_v21 = vld [vmem:[%s2899_s0 + $0x10] sm:$0xf]  ;;  %v1700_v24 = vor.u32 %v1930_v4, %v1699_v3  ;;  %v1764_v28 = vor.u32 %v1946_v8, %v1763_v7  ;;  %v1440_v33 = vor.u32 %v1863_v13, %v1437_v14 }
  0x35   :  { %933 = vmatpush.bf16.msrb.mxu1 %v1668_v25  ;;  %v1895_v18 = vld [vmem:[%s2900_s1 + $0x1f4] sm:$0xf]  ;;  %v1565_v20 = vld [vmem:[%s2900_s1 + $0x1f8] sm:$0xf0]  ;;  %v1831_v22 = vld [vmem:[%s2899_s0 + $0x2c] sm:$0xf0]  ;;  %v1504_v34 = vor.u32 %v1879_v15, %v1501_v16 }
  0x36   :  { %947 = vmatpush.bf16.msrb.mxu2 %v1732_v26  ;;  %v1307_v25 = vld [vmem:[%s2899_s0 + $0x18] sm:$0xf]  ;;  %v1827_v27 = vld [vmem:[%s2899_s0 + $0x14] sm:$0xf]  ;;  %v1828_v31 = vld [vmem:[%s2899_s0 + $0x1c] sm:$0xf]  ;;  %v2498_v39 = vor.u32 %v1831_v22, %v1299_v21 }
  0x37   :  { %961 = vmatpush.bf16.msrb.mxu3 %v1796_v30  ;;  %v1832_v26 = vld [vmem:[%s2899_s0 + $0x34] sm:$0xf0]  ;;  %v1301_v30 = vld [vmem:[%s2899_s0 + $0x30] sm:$0xf0]  ;;  %v1309_v32 = vld [vmem:[%s2899_s0 + $0x38] sm:$0xf0] }
  0x38   :  { %920 = vmatpush.bf16.msrb.mxu0 %v1596_v36  ;;  %v1845_v35 = vld [vmem:[%s2900_s1 + $0x64] sm:$0xf]  ;;  %v1365_v36 = vld [vmem:[%s2900_s1 + $0x68] sm:$0xf0]  ;;  %v2509_v43 = vor.u32 %v1832_v26, %v1307_v25  ;;  %v2511_v44 = vor.u32 %v1827_v27, %v1301_v30  ;;  %v2519_v47 = vor.u32 %v1828_v31, %v1309_v32  ;;  %v1357_v52 = vld [vmem:[%s2900_s1 + $0x58] sm:$0xf0] }
  0x39   :  { %934 = vmatpush.bf16.msrb.mxu1 %v1660_v37  ;;  %v1861_v37 = vld [vmem:[%s2900_s1 + $0xe4] sm:$0xf]  ;;  %v1429_v40 = vld [vmem:[%s2900_s1 + $0xe8] sm:$0xf0]  ;;  %v1859_v53 = vld [vmem:[%s2900_s1 + $0xd4] sm:$0xf] }
  0x3a   :  { %948 = vmatpush.bf16.msrb.mxu2 %v1724_v38  ;;  %v1568_v38 = vor.u32 %v1895_v18, %v1565_v20  ;;  %v1877_v41 = vld [vmem:[%s2900_s1 + $0x164] sm:$0xf]  ;;  %v1557_v46 = vld [vmem:[%s2900_s1 + $0x1e8] sm:$0xf0]  ;;  %v1432_v49 = vor.u32 %v1861_v37, %v1429_v40  ;;  %v1875_v56 = vld [vmem:[%s2900_s1 + $0x154] sm:$0xf] }
  0x3b   :  { %962 = vmatpush.bf16.msrb.mxu3 %v1788_v42  ;;  %v1493_v42 = vld [vmem:[%s2900_s1 + $0x168] sm:$0xf0]  ;;  %v1893_v45 = vld [vmem:[%s2900_s1 + $0x1e4] sm:$0xf]  ;;  %v1485_v57 = vld [vmem:[%s2900_s1 + $0x158] sm:$0xf0] }
  0x3c   :  { %921 = vmatpush.bf16.msrb.mxu0 %v1588_v48  ;;  %v1368_v48 = vor.u32 %v1845_v35, %v1365_v36  ;;  %v1560_v54 = vor.u32 %v1893_v45, %v1557_v46  ;;  %v1891_v59 = vld [vmem:[%s2900_s1 + $0x1d4] sm:$0xf]  ;;  %v1549_v60 = vld [vmem:[%s2900_s1 + $0x1d8] sm:$0xf0]  ;;  %v1841_v0 = vld [vmem:[%s2900_s1 + $0x44] sm:$0xf] }
  0x3d   :  { %935 = vmatpush.bf16.msrb.mxu1 %v1652_v50  ;;  %v1496_v50 = vor.u32 %v1877_v41, %v1493_v42  ;;  %v1349_v2 = vld [vmem:[%s2900_s1 + $0x48] sm:$0xf0]  ;;  %v1857_v3 = vld [vmem:[%s2900_s1 + $0xc4] sm:$0xf]  ;;  %v1552_v4 = vor.u32 %v1891_v59, %v1549_v60  ;;  %v1839_v14 = vld [vmem:[%s2900_s1 + $0x34] sm:$0xf] }
  0x3e   :  { %949 = vmatpush.bf16.msrb.mxu2 %v1716_v51  ;;  %v1843_v51 = vld [vmem:[%s2900_s1 + $0x54] sm:$0xf]  ;;  %v1477_v7 = vld [vmem:[%s2900_s1 + $0x148] sm:$0xf0]  ;;  %v1889_v8 = vld [vmem:[%s2900_s1 + $0x1c4] sm:$0xf] }
  0x3f   :  { %963 = vmatpush.bf16.msrb.mxu3 %v1780_v55  ;;  %v1421_v55 = vld [vmem:[%s2900_s1 + $0xd8] sm:$0xf0]  ;;  %v1360_v61 = vor.u32 %v1843_v51, %v1357_v52  ;;  %v1541_v9 = vld [vmem:[%s2900_s1 + $0x1c8] sm:$0xf0]  ;;  %v1855_v16 = vld [vmem:[%s2900_s1 + $0xb4] sm:$0xf] }
  0x40   :  { %922 = vmatpush.bf16.msrb.mxu0 %v1580_v63  ;;  %v1424_v62 = vor.u32 %v1859_v53, %v1421_v55  ;;  %v1488_v63 = vor.u32 %v1875_v56, %v1485_v57  ;;  %v1341_v15 = vld [vmem:[%s2900_s1 + $0x38] sm:$0xf0]  ;;  %v1544_v18 = vor.u32 %v1889_v8, %v1541_v9  ;;  %v1871_v20 = vld [vmem:[%s2900_s1 + $0x134] sm:$0xf]  ;;  %v1837_v27 = vld [vmem:[%s2900_s1 + $0x24] sm:$0xf] }
  0x41   :  { %936 = vmatpush.bf16.msrb.mxu1 %v1644_v5  ;;  %v1413_v5 = vld [vmem:[%s2900_s1 + $0xc8] sm:$0xf0]  ;;  %v1469_v21 = vld [vmem:[%s2900_s1 + $0x138] sm:$0xf0]  ;;  %v1887_v22 = vld [vmem:[%s2900_s1 + $0x1b4] sm:$0xf] }
  0x42   :  { %950 = vmatpush.bf16.msrb.mxu2 %v1708_v6  ;;  %v1873_v6 = vld [vmem:[%s2900_s1 + $0x144] sm:$0xf]  ;;  %v1416_v12 = vor.u32 %v1857_v3, %v1413_v5  ;;  %v1472_v26 = vor.u32 %v1871_v20, %v1469_v21  ;;  %v1397_v31 = vld [vmem:[%s2900_s1 + $0xa8] sm:$0xf0]  ;;  %v1835_v40 = vld [vmem:[%s2900_s1 + $0x14] sm:$0xf] }
  0x43   :  { %964 = vmatpush.bf16.msrb.mxu3 %v1772_v11  ;;  %v1352_v11 = vor.u32 %v1841_v0, %v1349_v2  ;;  %v1480_v13 = vor.u32 %v1873_v6, %v1477_v7  ;;  %v1869_v32 = vld [vmem:[%s2900_s1 + $0x124] sm:$0xf]  ;;  %v1525_v35 = vld [vmem:[%s2900_s1 + $0x1a8] sm:$0xf0]  ;;  %v1325_v41 = vld [vmem:[%s2900_s1 + $0x18] sm:$0xf0] }
  0x44   :  { %923 = vmatpush.bf16.msrb.mxu0 %v1572_v19  ;;  %v1405_v19 = vld [vmem:[%s2900_s1 + $0xb8] sm:$0xf0]  ;;  %v1851_v42 = vld [vmem:[%s2900_s1 + $0x94] sm:$0xf]  ;;  %v1328_v52 = vor.u32 %v1835_v40, %v1325_v41  ;;  %v1833_v53 = vld [vmem:[%s2900_s1 + $0x4] sm:$0xf] }
  0x45   :  { %937 = vmatpush.bf16.msrb.mxu1 %v1636_v23  ;;  %v1533_v23 = vld [vmem:[%s2900_s1 + $0x1b8] sm:$0xf0]  ;;  %v1408_v25 = vor.u32 %v1855_v16, %v1405_v19  ;;  %v1849_v57 = vld [vmem:[%s2900_s1 + $0x84] sm:$0xf]  ;;  %v1381_v59 = vld [vmem:[%s2900_s1 + $0x88] sm:$0xf0] }
  0x46   :  { %951 = vmatpush.bf16.msrb.mxu2 %v1700_v24  ;;  %v1344_v24 = vor.u32 %v1839_v14, %v1341_v15  ;;  %v1536_v30 = vor.u32 %v1887_v22, %v1533_v23  ;;  %v1389_v46 = vld [vmem:[%s2900_s1 + $0x98] sm:$0xf0]  ;;  %v1865_v60 = vld [vmem:[%s2900_s1 + $0x104] sm:$0xf]  ;;  %v1509_v0 = vld [vmem:[%s2900_s1 + $0x188] sm:$0xf0]  ;;  %v1384_v9 = vor.u32 %v1849_v57, %v1381_v59 }
  0x47   :  { %965 = vmatpush.bf16.msrb.mxu3 %v1764_v28  ;;  %924 = vmatmul.bf16.vlgmr.msrb.gmra.mxu0 %v2498_v39  ;;  %v1333_v28 = vld [vmem:[%s2900_s1 + $0x28] sm:$0xf0]  ;;  %v1517_v51 = vld [vmem:[%s2900_s1 + $0x198] sm:$0xf0]  ;;  %v1392_v55 = vor.u32 %v1851_v42, %v1389_v46  ;;  %v1911_v2 = vld [vmem:[%s2900_s1 + $0x274] sm:$0xf] }
  0x48   :  { %972 = vmatpush.bf16.msra.mxu0 %v1376_v29  ;;  %938 = vmatmul.bf16.vlgmr.msrb.gmra.mxu1 %v2511_v44  ;;  %v1853_v29 = vld [vmem:[%s2900_s1 + $0xa4] sm:$0xf]  ;;  %v1336_v36 = vor.u32 %v1837_v27, %v1333_v28  ;;  %v1629_v3 = vld [vmem:[%s2900_s1 + $0x278] sm:$0xf0]  ;;  %v1943_v7 = vld [vmem:[%s2900_s1 + $0x374] sm:$0xf] }
  0x49   :  { %986 = vmatpush.bf16.msra.mxu1 %v1440_v33  ;;  %952 = vmatmul.bf16.vlgmr.msrb.gmra.mxu2 %v2509_v43  ;;  %v1461_v33 = vld [vmem:[%s2900_s1 + $0x128] sm:$0xf0]  ;;  %v1400_v37 = vor.u32 %v1853_v29, %v1397_v31  ;;  %v1693_v6 = vld [vmem:[%s2900_s1 + $0x2f8] sm:$0xf0]  ;;  %v1632_v15 = vor.u32 %v1911_v2, %v1629_v3  ;;  %v1909_v19 = vld [vmem:[%s2900_s1 + $0x264] sm:$0xf] }
  0x4a   :  { %1000 = vmatpush.bf16.msra.mxu2 %v1504_v34  ;;  %966 = vmatmul.bf16.vlgmr.msrb.gmra.mxu3 %v2519_v47  ;;  %v1885_v34 = vld [vmem:[%s2900_s1 + $0x1a4] sm:$0xf]  ;;  %v1757_v8 = vld [vmem:[%s2900_s1 + $0x378] sm:$0xf0]  ;;  %v1621_v20 = vld [vmem:[%s2900_s1 + $0x268] sm:$0xf0] }
  0x4b   :  { %1014 = vmatpush.bf16.msra.mxu3 %v1568_v38  ;;  %v1464_v38 = vor.u32 %v1869_v32, %v1461_v33  ;;  %v1528_v45 = vor.u32 %v1885_v34, %v1525_v35  ;;  %v1925_v21 = vld [vmem:[%s2900_s1 + $0x2e4] sm:$0xf]  ;;  %v1685_v23 = vld [vmem:[%s2900_s1 + $0x2e8] sm:$0xf0]  ;;  %v1624_v28 = vor.u32 %v1909_v19, %v1621_v20  ;;  %v1907_v31 = vld [vmem:[%s2900_s1 + $0x254] sm:$0xf] }
  0x4c   :  { %973 = vmatpush.bf16.msra.mxu0 %v1368_v48  ;;  %v1867_v48 = vld [vmem:[%s2900_s1 + $0x114] sm:$0xf]  ;;  %v1813_v27 = vld [vmem:[%s2900_s1 + $0x3e8] sm:$0xf0]  ;;  %v1688_v29 = vor.u32 %v1925_v21, %v1685_v23  ;;  %v1613_v32 = vld [vmem:[%s2900_s1 + $0x258] sm:$0xf0] }
  0x4d   :  { %987 = vmatpush.bf16.msra.mxu1 %v1432_v49  ;;  %v1453_v49 = vld [vmem:[%s2900_s1 + $0x118] sm:$0xf0]  ;;  %v1923_v33 = vld [vmem:[%s2900_s1 + $0x2d4] sm:$0xf]  ;;  %v1616_v40 = vor.u32 %v1907_v31, %v1613_v32  ;;  %v1897_v31 = vld [vmem:[%s2900_s1 + $0x204] sm:$0xf] }
  0x4e   :  { %1001 = vmatpush.bf16.msra.mxu2 %v1496_v50  ;;  %v1883_v50 = vld [vmem:[%s2900_s1 + $0x194] sm:$0xf]  ;;  %v1456_v56 = vor.u32 %v1867_v48, %v1453_v49  ;;  %v1677_v35 = vld [vmem:[%s2900_s1 + $0x2d8] sm:$0xf0]  ;;  %v1937_v48 = vld [vmem:[%s2900_s1 + $0x344] sm:$0xf] }
  0x4f   :  { %1015 = vmatpush.bf16.msra.mxu3 %v1560_v54  ;;  %v1317_v54 = vld [vmem:[%s2900_s1 + $0x8] sm:$0xf0]  ;;  %v1680_v41 = vor.u32 %v1923_v33, %v1677_v35  ;;  %v1919_v57 = vld [vmem:[%s2900_s1 + $0x2b4] sm:$0xf]  ;;  %v1581_v20 = vld [vmem:[%s2900_s1 + $0x218] sm:$0xf0] }
  0x50   :  { %974 = vmatpush.bf16.msra.mxu0 %v1360_v61  ;;  %v1520_v61 = vor.u32 %v1883_v50, %v1517_v51  ;;  %v1320_v5 = vor.u32 %v1833_v53, %v1317_v54  ;;  %v1733_v49 = vld [vmem:[%s2900_s1 + $0x348] sm:$0xf0]  ;;  %v1953_v50 = vld [vmem:[%s2900_s1 + $0x3c4] sm:$0xf]  ;;  %v1899_v19 = vld [vmem:[%s2900_s1 + $0x214] sm:$0xf] }
  0x51   :  { %988 = vmatpush.bf16.msra.mxu1 %v1424_v62  ;;  %v1445_v62 = vld [vmem:[%s2900_s1 + $0x108] sm:$0xf0]  ;;  %v1736_v54 = vor.u32 %v1937_v48, %v1733_v49  ;;  %v1915_v21 = vld [vmem:[%s2900_s1 + $0x294] sm:$0xf]  ;;  %v1645_v23 = vld [vmem:[%s2900_s1 + $0x298] sm:$0xf0] }
  0x52   :  { %1002 = vmatpush.bf16.msra.mxu2 %v1488_v63  ;;  %v1881_v63 = vld [vmem:[%s2900_s1 + $0x184] sm:$0xf]  ;;  %v1797_v51 = vld [vmem:[%s2900_s1 + $0x3c8] sm:$0xf0]  ;;  %v1138_v48 = vld [vmem:[#allocation3 + $0xd0] sm:$0xff]  ;;  %vm1109_vm0 = vcmask 7168  }
  0x53   :  { %1016 = vmatpush.bf16.msra.mxu3 %v1552_v4  ;;  %v1927_v4 = vld [vmem:[%s2900_s1 + $0x2f4] sm:$0xf]  ;;  %v1512_v14 = vor.u32 %v1881_v63, %v1509_v0  ;;  %v1800_v59 = vor.u32 %v1953_v50, %v1797_v51  ;;  %v1789_v0 = vld [vmem:[%s2900_s1 + $0x3b8] sm:$0xf0]  ;;  %v1573_v32 = vld [vmem:[%s2900_s1 + $0x208] sm:$0xf0] }
  0x54   :  { %975 = vmatpush.bf16.msra.mxu0 %v1352_v11  ;;  %v1448_v11 = vor.u32 %v1865_v60, %v1445_v62  ;;  %v1696_v16 = vor.u32 %v1927_v4, %v1693_v6  ;;  %v1661_v60 = vld [vmem:[%s2900_s1 + $0x2b8] sm:$0xf0]  ;;  %v1951_v63 = vld [vmem:[%s2900_s1 + $0x3b4] sm:$0xf]  ;;  %v1589_v6 = vld [vmem:[%s2900_s1 + $0x228] sm:$0xf0] }
  0x55   :  { %989 = vmatpush.bf16.msra.mxu1 %v1416_v12  ;;  %v1959_v12 = vld [vmem:[%s2900_s1 + $0x3f4] sm:$0xf]  ;;  %v1725_v62 = vld [vmem:[%s2900_s1 + $0x338] sm:$0xf0]  ;;  %v1664_v3 = vor.u32 %v1919_v57, %v1661_v60  ;;  %v1913_v33 = vld [vmem:[%s2900_s1 + $0x284] sm:$0xf] }
  0x56   :  { %1003 = vmatpush.bf16.msra.mxu2 %v1480_v13  ;;  %v1821_v13 = vld [vmem:[%s2900_s1 + $0x3f8] sm:$0xf0]  ;;  %v1637_v35 = vld [vmem:[%s2900_s1 + $0x288] sm:$0xf0]  ;;  %v1136_v50 = vld [vmem:[#allocation3 + $0xc0] sm:$0xff] }
  0x57   :  { %1017 = vmatpush.bf16.msra.mxu3 %v1544_v18  ;;  %v1760_v18 = vor.u32 %v1943_v7, %v1757_v8  ;;  %v1824_v22 = vor.u32 %v1959_v12, %v1821_v13  ;;  %v1917_v7 = vld [vmem:[%s2900_s1 + $0x2a4] sm:$0xf]  ;;  %v1792_v8 = vor.u32 %v1951_v63, %v1789_v0  ;;  %v1717_v12 = vld [vmem:[%s2900_s1 + $0x328] sm:$0xf0]  ;;  %v1139_v49 = vld [vmem:[#allocation3 + $0xd8] sm:$0xff] }
  0x58   :  { %976 = vmatpush.bf16.msra.mxu0 %v1344_v24  ;;  %v1941_v24 = vld [vmem:[%s2900_s1 + $0x364] sm:$0xf]  ;;  %v1137_v51 = vld [vmem:[#allocation3 + $0xc8] sm:$0xff]  ;;  %v1127_v57 = vld [vmem:[#allocation3 + $0x78] sm:$0xff] }
  0x59   :  { %990 = vmatpush.bf16.msra.mxu1 %v1408_v25  ;;  %v1749_v25 = vld [vmem:[%s2900_s1 + $0x368] sm:$0xf0]  ;;  %v1949_v13 = vld [vmem:[%s2900_s1 + $0x3a4] sm:$0xf] }
  0x5a   :  { %1004 = vmatpush.bf16.msra.mxu2 %v1472_v26  ;;  %v1957_v26 = vld [vmem:[%s2900_s1 + $0x3e4] sm:$0xf]  ;;  %v1125_v60 = vld [vmem:[#allocation3 + $0x68] sm:$0xff] }
  0x5b   :  { %1018 = vmatpush.bf16.msra.mxu3 %v1536_v30  ;;  %v1752_v30 = vor.u32 %v1941_v24, %v1749_v25  ;;  %v1816_v34 = vor.u32 %v1957_v26, %v1813_v27  ;;  %v1931_v24 = vld [vmem:[%s2900_s1 + $0x314] sm:$0xf]  ;;  %v1709_v25 = vld [vmem:[%s2900_s1 + $0x318] sm:$0xf0]  ;;  %v1120_v63 = vld [vmem:[#allocation3 + $0x40] sm:$0xff] }
  0x5c   :  { %977 = vmatpush.bf16.msra.mxu0 %v1336_v36  ;;  %v1939_v36 = vld [vmem:[%s2900_s1 + $0x354] sm:$0xf]  ;;  %v1773_v27 = vld [vmem:[%s2900_s1 + $0x398] sm:$0xf0]  ;;  %v1121_v0 = vld [vmem:[#allocation3 + $0x48] sm:$0xff] }
  0x5d   :  { %991 = vmatpush.bf16.msra.mxu1 %v1400_v37  ;;  %v1741_v37 = vld [vmem:[%s2900_s1 + $0x358] sm:$0xf0]  ;;  %v1947_v26 = vld [vmem:[%s2900_s1 + $0x394] sm:$0xf] }
  0x5e   :  { %1005 = vmatpush.bf16.msra.mxu2 %v1464_v38  ;;  %v1955_v38 = vld [vmem:[%s2900_s1 + $0x3d4] sm:$0xf]  ;;  %v1744_v42 = vor.u32 %v1939_v36, %v1741_v37  ;;  %v1929_v36 = vld [vmem:[%s2900_s1 + $0x304] sm:$0xf]  ;;  %v1701_v37 = vld [vmem:[%s2900_s1 + $0x308] sm:$0xf0] }
  0x5f   :  { %1019 = vmatpush.bf16.msra.mxu3 %v1528_v45  ;;  %v1605_v45 = vld [vmem:[%s2900_s1 + $0x248] sm:$0xf0] }
  0x60   :  { %978 = vmatpush.bf16.msra.mxu0 %v1328_v52 }
  0x61   :  { %992 = vmatpush.bf16.msra.mxu1 %v1392_v55  ;;  %v1903_v55 = vld [vmem:[%s2900_s1 + $0x234] sm:$0xf] }
  0x62   :  { %1006 = vmatpush.bf16.msra.mxu2 %v1456_v56  ;;  %v1597_v56 = vld [vmem:[%s2900_s1 + $0x238] sm:$0xf0] }
  0x63   :  { %1020 = vmatpush.bf16.msra.mxu3 %v1520_v61  ;;  %v1935_v61 = vld [vmem:[%s2900_s1 + $0x334] sm:$0xf]  ;;  %v1600_v2 = vor.u32 %v1903_v55, %v1597_v56  ;;  %v1129_v55 = vld [vmem:[#allocation3 + $0x88] sm:$0xff] }
  0x64   :  { %979 = vmatpush.bf16.msra.mxu0 %v1320_v5  ;;  %v1728_v4 = vor.u32 %v1935_v61, %v1725_v62  ;;  %v1901_v5 = vld [vmem:[%s2900_s1 + $0x224] sm:$0xf]  ;;  %v1126_v56 = vld [vmem:[#allocation3 + $0x70] sm:$0xff]  ;;  %v1123_v62 = vld [vmem:[#allocation3 + $0x58] sm:$0xff] }
  0x65   :  { %993 = vmatpush.bf16.msra.mxu1 %v1384_v9  ;;  %v1653_v9 = vld [vmem:[%s2900_s1 + $0x2a8] sm:$0xf0]  ;;  %v1122_v61 = vld [vmem:[#allocation3 + $0x50] sm:$0xff] }
  0x66   :  { %1007 = vmatpush.bf16.msra.mxu2 %v1448_v11  ;;  %v1933_v11 = vld [vmem:[%s2900_s1 + $0x324] sm:$0xf] }
  0x67   :  { %1021 = vmatpush.bf16.msra.mxu3 %v1512_v14  ;;  %980 = vmatmul.bf16.vlgmr.msra.gmra.mxu0 %v2276_v58  ;;  %v1921_v58 = vld [vmem:[%s2900_s1 + $0x2c4] sm:$0xf]  ;;  %v1781_v14 = vld [vmem:[%s2900_s1 + $0x3a8] sm:$0xf0] }
  0x68   :  { %1028 = vmatpush.bf16.msrb.mxu0 %v1632_v15  ;;  %994 = vmatmul.bf16.vlgmr.msra.gmra.mxu1 %v2312_v10  ;;  %v1669_v10 = vld [vmem:[%s2900_s1 + $0x2c8] sm:$0xf0]  ;;  %v1592_v15 = vor.u32 %v1901_v5, %v1589_v6  ;;  %v1114_v6 = vld [vmem:[#allocation3 + $0x10] sm:$0xff] }
  0x69   :  { %1042 = vmatpush.bf16.msrb.mxu1 %v1696_v16  ;;  %1008 = vmatmul.bf16.vlgmr.msra.gmra.mxu2 %v2290_v1  ;;  %v1805_v1 = vld [vmem:[%s2900_s1 + $0x3d8] sm:$0xf0]  ;;  %v1672_v53 = vor.u32 %v1921_v58, %v1669_v10  ;;  %v1656_v16 = vor.u32 %v1917_v7, %v1653_v9  ;;  %v1141_v10 = vld [vmem:[#allocation3 + $0xe8] sm:$0xff] }
  0x6a   :  { %1056 = vmatpush.bf16.msrb.mxu2 %v1760_v18  ;;  %1022 = vmatmul.bf16.vlgmr.msra.gmra.mxu3 %v2326_v17  ;;  %v1905_v17 = vld [vmem:[%s2900_s1 + $0x244] sm:$0xf]  ;;  %v1808_v46 = vor.u32 %v1955_v38, %v1805_v1  ;;  %v1720_v18 = vor.u32 %v1933_v11, %v1717_v12  ;;  %v1765_v1 = vld [vmem:[%s2900_s1 + $0x388] sm:$0xf0]  ;;  %v1143_v58 = vld [vmem:[#allocation3 + $0xf8] sm:$0xff] }
  0x6b   :  { %1070 = vmatpush.bf16.msrb.mxu3 %v1824_v22  ;;  %v1608_v52 = vor.u32 %v1905_v17, %v1605_v45  ;;  %v1784_v22 = vor.u32 %v1949_v13, %v1781_v14  ;;  %v1945_v38 = vld [vmem:[%s2900_s1 + $0x384] sm:$0xf]  ;;  %v1142_v45 = vld [vmem:[#allocation3 + $0xf0] sm:$0xff]  ;;  %v1117_v5 = vld [vmem:[#allocation3 + $0x28] sm:$0xff] }
  0x6c   :  { %1029 = vmatpush.bf16.msrb.mxu0 %v1624_v28  ;;  %v1584_v28 = vor.u32 %v1899_v19, %v1581_v20  ;;  %v1768_v17 = vor.u32 %v1945_v38, %v1765_v1  ;;  %v1115_v7 = vld [vmem:[#allocation3 + $0x18] sm:$0xff]  ;;  %v1113_v9 = vld [vmem:[#allocation3 + $0x8] sm:$0xff] }
  0x6d   :  { %1043 = vmatpush.bf16.msrb.mxu1 %v1688_v29  ;;  %v1648_v29 = vor.u32 %v1915_v21, %v1645_v23  ;;  %v1171_v1 = vld [vmem:[#allocation3 + $0x1d8] sm:$0xff] }
  0x6e   :  { %1057 = vmatpush.bf16.msrb.mxu2 %v1752_v30  ;;  %v1712_v30 = vor.u32 %v1931_v24, %v1709_v25 }
  0x6f   :  { %1071 = vmatpush.bf16.msrb.mxu3 %v1816_v34  ;;  %v1776_v34 = vor.u32 %v1947_v26, %v1773_v27 }
  0x70   :  { %1030 = vmatpush.bf16.msrb.mxu0 %v1616_v40  ;;  %v1576_v40 = vor.u32 %v1897_v31, %v1573_v32  ;;  %v1172_v32 = vld [vmem:[#allocation3 + $0x1e0] sm:$0xff] }
  0x71   :  { %1044 = vmatpush.bf16.msrb.mxu1 %v1680_v41  ;;  %v1640_v41 = vor.u32 %v1913_v33, %v1637_v35  ;;  %v1173_v33 = vld [vmem:[#allocation3 + $0x1e8] sm:$0xff] }
  0x72   :  { %1058 = vmatpush.bf16.msrb.mxu2 %v1744_v42  ;;  %v1704_v42 = vor.u32 %v1929_v36, %v1701_v37 }
  0x73   :  { %1072 = vmatpush.bf16.msrb.mxu3 %v1808_v46  ;;  %v1140_v46 = vld [vmem:[#allocation3 + $0xe0] sm:$0xff] }
  0x74   :  { %1031 = vmatpush.bf16.msrb.mxu0 %v1608_v52  ;;  %v1134_v52 = vld [vmem:[#allocation3 + $0xb0] sm:$0xff] }
  0x75   :  { %1045 = vmatpush.bf16.msrb.mxu1 %v1672_v53  ;;  %v1132_v53 = vld [vmem:[#allocation3 + $0xa0] sm:$0xff] }
  0x76   :  { %1059 = vmatpush.bf16.msrb.mxu2 %v1736_v54  ;;  %v1128_v54 = vld [vmem:[#allocation3 + $0x80] sm:$0xff] }
  0x77   :  { %1073 = vmatpush.bf16.msrb.mxu3 %v1800_v59  ;;  %v1124_v59 = vld [vmem:[#allocation3 + $0x60] sm:$0xff] }
  0x78   :  { %1032 = vmatpush.bf16.msrb.mxu0 %v1600_v2  ;;  %v1118_v2 = vld [vmem:[#allocation3 + $0x30] sm:$0xff] }
  0x79   :  { %1046 = vmatpush.bf16.msrb.mxu1 %v1664_v3  ;;  %v1119_v3 = vld [vmem:[#allocation3 + $0x38] sm:$0xff] }
  0x7a   :  { %1060 = vmatpush.bf16.msrb.mxu2 %v1728_v4  ;;  %v1116_v4 = vld [vmem:[#allocation3 + $0x20] sm:$0xff] }
  0x7b   :  { %1074 = vmatpush.bf16.msrb.mxu3 %v1792_v8  ;;  %v1112_v8 = vld [vmem:[#allocation3] sm:$0xff] }
  0x7c   :  { %1033 = vmatpush.bf16.msrb.mxu0 %v1592_v15 }
  0x7d   :  { %1047 = vmatpush.bf16.msrb.mxu1 %v1656_v16 }
  0x7e   :  { %1061 = vmatpush.bf16.msrb.mxu2 %v1720_v18 }
  0x7f   :  { %1075 = vmatpush.bf16.msrb.mxu3 %v1784_v22 }
  0x80   :  { %1034 = vmatpush.bf16.msrb.mxu0 %v1584_v28 }
  0x81   :  { %1048 = vmatpush.bf16.msrb.mxu1 %v1648_v29  ;;  %v1174_v29 = vld [vmem:[#allocation3 + $0x1f0] sm:$0xff] }
  0x82   :  { %1062 = vmatpush.bf16.msrb.mxu2 %v1712_v30  ;;  %v1175_v30 = vld [vmem:[#allocation3 + $0x1f8] sm:$0xff] }
  0x83   :  { %1076 = vmatpush.bf16.msrb.mxu3 %v1776_v34  ;;  %v1170_v34 = vld [vmem:[#allocation3 + $0x1d0] sm:$0xff] }
  0x84   :  { %1035 = vmatpush.bf16.msrb.mxu0 %v1576_v40 }
  0x85   :  { %1049 = vmatpush.bf16.msrb.mxu1 %v1640_v41 }
  0x86   :  { %1063 = vmatpush.bf16.msrb.mxu2 %v1704_v42  ;;  %v1168_v42 = vld [vmem:[#allocation3 + $0x1c0] sm:$0xff] }
  0x87   :  { %1077 = vmatpush.bf16.msrb.mxu3 %v1768_v17  ;;  %1036 = vmatmul.bf16.vlgmr.msrb.gmra.mxu0 %v2498_v39  ;;  %v1135_v39 = vld [vmem:[#allocation3 + $0xb8] sm:$0xff]  ;;  %v1169_v17 = vld [vmem:[#allocation3 + $0x1c8] sm:$0xff] }
  0x88   :  { %1176 = vmatpush.msra.mxu0 %v1142_v45  ;;  %1050 = vmatmul.bf16.vlgmr.msrb.gmra.mxu1 %v2511_v44  ;;  %v1133_v44 = vld [vmem:[#allocation3 + $0xa8] sm:$0xff] }
  0x89   :  { %1064 = vmatmul.bf16.vlgmr.msrb.gmra.mxu2 %v2509_v43  ;;  %v1130_v43 = vld [vmem:[#allocation3 + $0x90] sm:$0xff]  ;;  %1199 = vmatpush.msra.mxu1 %v1174_v29 }
  0x8a   :  { %1222 = vmatpush.msra.mxu2 %v1143_v58  ;;  %1078 = vmatmul.bf16.vlgmr.msrb.gmra.mxu3 %v2519_v47  ;;  %v1131_v47 = vld [vmem:[#allocation3 + $0x98] sm:$0xff]  ;;  %v1166_v58 = vld [vmem:[#allocation3 + $0x1b0] sm:$0xff] }
  0x8b   :  { %1177 = vmatpush.msra.mxu0 %v1140_v46  ;;  %1245 = vmatpush.msra.mxu3 %v1175_v30  ;;  %v1167_v46 = vld [vmem:[#allocation3 + $0x1b8] sm:$0xff] }
  0x8c   :  { %1223 = vmatpush.msra.mxu2 %v1141_v10  ;;  %1200 = vmatpush.msra.mxu1 %v1172_v32 }
  0x8d   :  { %1178 = vmatpush.msra.mxu0 %v1138_v48  ;;  %1246 = vmatpush.msra.mxu3 %v1173_v33 }
  0x8e   :  { %1224 = vmatpush.msra.mxu2 %v1139_v49  ;;  %1201 = vmatpush.msra.mxu1 %v1170_v34  ;;  %v1164_v49 = vld [vmem:[#allocation3 + $0x1a0] sm:$0xff] }
  0x8f   :  { %1179 = vmatpush.msra.mxu0 %v1136_v50  ;;  %1247 = vmatpush.msra.mxu3 %v1171_v1  ;;  %v1165_v50 = vld [vmem:[#allocation3 + $0x1a8] sm:$0xff] }
  0x90   :  { %1225 = vmatpush.msra.mxu2 %v1137_v51  ;;  %1202 = vmatpush.msra.mxu1 %v1168_v42 }
  0x91   :  { %1180 = vmatpush.msra.mxu0 %v1134_v52  ;;  %1248 = vmatpush.msra.mxu3 %v1169_v17 }
  0x92   :  { %1226 = vmatpush.msra.mxu2 %v1135_v39  ;;  %1203 = vmatpush.msra.mxu1 %v1166_v58  ;;  %v1162_v39 = vld [vmem:[#allocation3 + $0x190] sm:$0xff] }
  0x93   :  { %1181 = vmatpush.msra.mxu0 %v1132_v53  ;;  %1249 = vmatpush.msra.mxu3 %v1167_v46  ;;  %v1163_v53 = vld [vmem:[#allocation3 + $0x198] sm:$0xff] }
  0x94   :  { %1227 = vmatpush.msra.mxu2 %v1133_v44  ;;  %1204 = vmatpush.msra.mxu1 %v1164_v49 }
  0x95   :  { %1182 = vmatpush.msra.mxu0 %v1130_v43  ;;  %1250 = vmatpush.msra.mxu3 %v1165_v50  ;;  %v1160_v43 = vld [vmem:[#allocation3 + $0x180] sm:$0xff] }
  0x96   :  { %1228 = vmatpush.msra.mxu2 %v1131_v47  ;;  %v1161_v47 = vld [vmem:[#allocation3 + $0x188] sm:$0xff]  ;;  %1205 = vmatpush.msra.mxu1 %v1162_v39 }
  0x97   :  { %1183 = vmatpush.msra.mxu0 %v1128_v54  ;;  %1251 = vmatpush.msra.mxu3 %v1163_v53  ;;  %v1158_v54 = vld [vmem:[#allocation3 + $0x170] sm:$0xff] }
  0x98   :  { %1229 = vmatpush.msra.mxu2 %v1129_v55  ;;  %v1159_v55 = vld [vmem:[#allocation3 + $0x178] sm:$0xff]  ;;  %1206 = vmatpush.msra.mxu1 %v1160_v43 }
  0x99   :  { %1184 = vmatpush.msra.mxu0 %v1126_v56  ;;  %1252 = vmatpush.msra.mxu3 %v1161_v47  ;;  %v1156_v56 = vld [vmem:[#allocation3 + $0x160] sm:$0xff] }
  0x9a   :  { %1230 = vmatpush.msra.mxu2 %v1127_v57  ;;  %v1157_v57 = vld [vmem:[#allocation3 + $0x168] sm:$0xff]  ;;  %1207 = vmatpush.msra.mxu1 %v1158_v54 }
  0x9b   :  { %1185 = vmatpush.msra.mxu0 %v1124_v59  ;;  %1253 = vmatpush.msra.mxu3 %v1159_v55  ;;  %v1154_v59 = vld [vmem:[#allocation3 + $0x150] sm:$0xff] }
  0x9c   :  { %1231 = vmatpush.msra.mxu2 %v1125_v60  ;;  %1208 = vmatpush.msra.mxu1 %v1156_v56  ;;  %v1155_v60 = vld [vmem:[#allocation3 + $0x158] sm:$0xff] }
  0x9d   :  { %1186 = vmatpush.msra.mxu0 %v1122_v61  ;;  %1254 = vmatpush.msra.mxu3 %v1157_v57  ;;  %v1152_v61 = vld [vmem:[#allocation3 + $0x140] sm:$0xff] }
  0x9e   :  { %1232 = vmatpush.msra.mxu2 %v1123_v62  ;;  %1209 = vmatpush.msra.mxu1 %v1154_v59  ;;  %v1153_v62 = vld [vmem:[#allocation3 + $0x148] sm:$0xff] }
  0x9f   :  { %1187 = vmatpush.msra.mxu0 %v1120_v63  ;;  %1255 = vmatpush.msra.mxu3 %v1155_v60  ;;  %v1150_v63 = vld [vmem:[#allocation3 + $0x130] sm:$0xff] }
  0xa0   :  { %1233 = vmatpush.msra.mxu2 %v1121_v0  ;;  %1210 = vmatpush.msra.mxu1 %v1152_v61  ;;  %v1151_v0 = vld [vmem:[#allocation3 + $0x138] sm:$0xff] }
  0xa1   :  { %1188 = vmatpush.msra.mxu0 %v1118_v2  ;;  %1256 = vmatpush.msra.mxu3 %v1153_v62  ;;  %v1148_v2 = vld [vmem:[#allocation3 + $0x120] sm:$0xff] }
  0xa2   :  { %1234 = vmatpush.msra.mxu2 %v1119_v3  ;;  %1211 = vmatpush.msra.mxu1 %v1150_v63  ;;  %v1149_v3 = vld [vmem:[#allocation3 + $0x128] sm:$0xff] }
  0xa3   :  { %1189 = vmatpush.msra.mxu0 %v1116_v4  ;;  %1257 = vmatpush.msra.mxu3 %v1151_v0  ;;  %v1146_v4 = vld [vmem:[#allocation3 + $0x110] sm:$0xff] }
  0xa4   :  { %1235 = vmatpush.msra.mxu2 %v1117_v5  ;;  %v869_v11 = vpop.f32.mrf.mxu0  ;;  %1212 = vmatpush.msra.mxu1 %v1148_v2  ;;  %v1147_v5 = vld [vmem:[#allocation3 + $0x118] sm:$0xff] }
  0xa5   :  { %1190 = vmatpush.msra.mxu0 %v1114_v6  ;;  %v883_v12 = vpop.f32.mrf.mxu1  ;;  %1258 = vmatpush.msra.mxu3 %v1149_v3  ;;  %v1144_v6 = vld [vmem:[#allocation3 + $0x100] sm:$0xff] }
  0xa6   :  { %1236 = vmatpush.msra.mxu2 %v1115_v7  ;;  %v884_v15 = vadd.f32 %v883_v12, %v869_v11  ;;  %1213 = vmatpush.msra.mxu1 %v1146_v4  ;;  %v1145_v7 = vld [vmem:[#allocation3 + $0x108] sm:$0xff] }
  0xa7   :  { %1191 = vmatpush.msra.mxu0 %v1112_v8  ;;  %1259 = vmatpush.msra.mxu3 %v1147_v5 }
  0xa8   :  { %1237 = vmatpush.msra.mxu2 %v1113_v9  ;;  %1214 = vmatpush.msra.mxu1 %v1144_v6 }
  0xa9   :  { %1260 = vmatpush.msra.mxu3 %v1145_v7 }
  0xac   :  { %v897_v13 = vpop.f32.mrf.mxu2  ;;  %v871_v16 = vpop.f32.mrf.mxu0 }
  0xad   :  { %v911_v14 = vpop.f32.mrf.mxu3  ;;  %v885_v18 = vpop.f32.mrf.mxu1  ;;  %v898_v19 = vadd.f32 %v897_v13, %v884_v15 }
  0xae   :  { %v886_v23 = vadd.f32 %v885_v18, %v871_v16 }
  0xaf   :  { %v912_v20 = vadd.f32 %v911_v14, %v898_v19 }
  0xb4   :  { %v899_v21 = vpop.f32.mrf.mxu2 }
  0xb5   :  { %v913_v22 = vpop.f32.mrf.mxu3  ;;  %v900_v27 = vadd.f32 %v899_v21, %v886_v23 }
  0xb7   :  { %v914_v35 = vadd.f32 %v913_v22, %v900_v27 }
  0xc4   :  { %v925_v24 = vpop.f32.mrf.mxu0 }
  0xc5   :  { %v926_v25 = vadd.f32 %v925_v24, %v912_v20  ;;  %v939_v26 = vpop.f32.mrf.mxu1 }
  0xc7   :  { %v940_v28 = vadd.f32 %v939_v26, %v926_v25 }
  0xcc   :  { %v953_v31 = vpop.f32.mrf.mxu2  ;;  %v927_v37 = vpop.f32.mrf.mxu0 }
  0xcd   :  { %v954_v36 = vadd.f32 %v953_v31, %v940_v28  ;;  %v967_v38 = vpop.f32.mrf.mxu3  ;;  %v928_v40 = vadd.f32 %v927_v37, %v914_v35  ;;  %v941_v45 = vpop.f32.mrf.mxu1 }
  0xcf   :  { %v2869_v41 = vadd.f32 %v967_v38, %v954_v36  ;;  %v942_v10 = vadd.f32 %v941_v45, %v928_v40 }
  0xd1   :  { %1192 = vmatmul.f32.vlgmr.msra.gmra.mxu0 %v2869_v41  ;;  %1238 = vmatmul.f32.vlgmr.msra.gmra.mxu2 %v2869_v41  ;;  %v1099_v34 = vmul.f32 %v2869_v41, %v2869_v41 }
  0xd4   :  { %v955_v48 = vpop.f32.mrf.mxu2 }
  0xd5   :  { %v956_v51 = vadd.f32 %v955_v48, %v942_v10  ;;  %v969_v52 = vpop.f32.mrf.mxu3 }
  0xd7   :  { %v2873_v44 = vadd.f32 %v969_v52, %v956_v51 }
  0xd9   :  { %1195 = vmatmul.f32.gmra.mxu0 %v2873_v44  ;;  %1241 = vmatmul.f32.gmra.mxu2 %v2873_v44  ;;  %v1101_v45 = vmul.f32 %v2873_v44, %v2873_v44 }
  0xe4   :  { %v981_v8 = vpop.f32.mrf.mxu0 }
  0xe5   :  { %v995_v9 = vpop.f32.mrf.mxu1 }
  0xe6   :  { %v996_v13 = vadd.f32 %v995_v9, %v981_v8 }
  0xec   :  { %v1009_v11 = vpop.f32.mrf.mxu2  ;;  %v983_v14 = vpop.f32.mrf.mxu0 }
  0xed   :  { %v1023_v12 = vpop.f32.mrf.mxu3  ;;  %v997_v15 = vpop.f32.mrf.mxu1  ;;  %v1010_v16 = vadd.f32 %v1009_v11, %v996_v13 }
  0xee   :  { %v998_v20 = vadd.f32 %v997_v15, %v983_v14 }
  0xef   :  { %v1024_v19 = vadd.f32 %v1023_v12, %v1010_v16 }
  0xf4   :  { %v1011_v18 = vpop.f32.mrf.mxu2 }
  0xf5   :  { %v1025_v21 = vpop.f32.mrf.mxu3  ;;  %v1012_v25 = vadd.f32 %v1011_v18, %v998_v20 }
  0xf7   :  { %v1026_v28 = vadd.f32 %v1025_v21, %v1012_v25 }
 0x104   :  { %v1037_v22 = vpop.f32.mrf.mxu0 }
 0x105   :  { %v1038_v23 = vadd.f32 %v1037_v22, %v1024_v19  ;;  %v1051_v24 = vpop.f32.mrf.mxu1 }
 0x107   :  { %v1052_v26 = vadd.f32 %v1051_v24, %v1038_v23 }
 0x10c   :  { %v1065_v27 = vpop.f32.mrf.mxu2  ;;  %v1039_v31 = vpop.f32.mrf.mxu0 }
 0x10d   :  { %v1066_v29 = vadd.f32 %v1065_v27, %v1052_v26  ;;  %v1079_v30 = vpop.f32.mrf.mxu3  ;;  %v1040_v33 = vadd.f32 %v1039_v31, %v1026_v28  ;;  %v1053_v36 = vpop.f32.mrf.mxu1 }
 0x10f   :  { %v1080_v32 = vadd.f32 %v1079_v30, %v1066_v29  ;;  %v1054_v37 = vadd.f32 %v1053_v36, %v1040_v33 }
 0x111   :  { %1215 = vmatmul.f32.vlgmr.msra.gmra.mxu1 %v1080_v32  ;;  %1261 = vmatmul.f32.vlgmr.msra.gmra.mxu3 %v1080_v32  ;;  %v1100_v35 = vmul.f32 %v1080_v32, %v1080_v32 }
 0x113   :  { %v1103_v38 = vadd.f32 %v1100_v35, %v1099_v34 }
 0x114   :  { %v1067_v1 = vpop.f32.mrf.mxu2 }
 0x115   :  { %v1068_v40 = vadd.f32 %v1067_v1, %v1054_v37  ;;  %1104 = vadd.xlane.f32.xlu0 %v1103_v38  ;;  %v1081_v42 = vpop.f32.mrf.mxu3 }
 0x117   :  { %v1082_v17 = vadd.f32 %v1081_v42, %v1068_v40 }
 0x119   :  { %1218 = vmatmul.f32.gmra.mxu1 %v1082_v17  ;;  %1264 = vmatmul.f32.gmra.mxu3 %v1082_v17  ;;  %v1102_v58 = vmul.f32 %v1082_v17, %v1082_v17 }
 0x11b   :  { %v1106_v46 = vadd.f32 %v1102_v58, %v1101_v45 }
 0x11d   :  { %1107 = vadd.xlane.f32.xlu0 %v1106_v46 }
 0x14e   :  { %v1193_v41 = vpop.f32.mrf.mxu0 }
 0x154   :  { %v1239_v51 = vpop.f32.mrf.mxu2 }
 0x156   :  { %v1196_v53 = vpop.f32.mrf.mxu0 }
 0x15c   :  { %v1242_v47 = vpop.f32.mrf.mxu2 }
 0x188   :  { %v1105_v10 = vpop.xlane.xlu0 %1104 }
 0x189   :  { %1110 = vst.msk [vmem:[%s2903_s4] sm:$0xff] %vm1109_vm0, %v1105_v10 }
 0x18e   :  { %v1216_v48 = vpop.f32.mrf.mxu1 }
 0x18f   :  { %v1217_v49 = vadd.f32 %v1216_v48, %v1193_v41 }
 0x190   :  { %v1108_v50 = vpop.xlane.xlu0 %1107 }
 0x191   :  { %1268 = vst [vmem:[%s2902_s3] sm:$0xff] %v1217_v49 }
 0x192   :  { %1111 = vst.msk [vmem:[%s2903_s4 + $0x8] sm:$0xff] %vm1109_vm0, %v1108_v50 }
 0x194   :  { %v1262_v52 = vpop.f32.mrf.mxu3 }
 0x195   :  { %v1263_v39 = vadd.f32 %v1262_v52, %v1239_v51 }
 0x196   :  { %v1219_v44 = vpop.f32.mrf.mxu1 }
 0x197   :  { %1269 = vst [vmem:[%s2902_s3 + $0x8] sm:$0xff] %v1263_v39  ;;  %v1220_v43 = vadd.f32 %v1219_v44, %v1196_v53 }
 0x199   :  { %1270 = vst [vmem:[%s2902_s3 + $0x10] sm:$0xff] %v1220_v43 }
 0x19c   :  { %v1265_v54 = vpop.f32.mrf.mxu3 }
 0x19d   :  { %v1266_v55 = vadd.f32 %v1265_v54, %v1242_v47 }
 0x19f   :  { %1271 = vst [vmem:[%s2902_s3 + $0x18] sm:$0xff] %v1266_v55 }
 0x1a0   :  { %1280 = vsyncpa [#allocation4], 1 }

</bundles_post_ra>
